<compile_context>
chip_gen: v7x
topology: tpu7x:2x2x1
jax: 0.10.0
libtpu: 0.0.40
codegen_flags: <defaults>
</compile_context>

<pallas_src>
import functools

import jax
import jax.numpy as jnp
from jax import lax
from jax.experimental import pallas as pl
from jax.experimental.pallas import tpu as pltpu

LANE = 128  # TPU lane width.


def _round_up(x, m):
    return (x + m - 1) // m * m


# ---------------------------------------------------------------------------
# Fused kernel: conv-as-GEMM (+bias, ReLU) -> partial channel sums accumulated
# across the M grid axis -> global-average-pool correction + fc on the last M step.
#   patches : (1, tile_m, K_pad)  bf16   raw im2col patches (norm folded into wc)
#   wc      : (K_pad, C_pad)      bf16   folded conv weight
#   bc      : (1, C_pad)          f32    folded conv bias
#   wfc     : (C_pad, NC_pad)     bf16   fc weight (transposed torch Linear)
#   bfc     : (1, NC_pad)         f32    fc bias
#   out     : (1, 8, NC_pad)      f32    logits (row 0 valid, lane-dense)
#   acc     : (8, C_pad)          f32    scratch: per-batch partial channel sums
# ---------------------------------------------------------------------------
def fused_conv_pool_fc_kernel(patches_ref, wc_ref, bc_ref, wfc_ref, bfc_ref,
                              o_ref, acc_ref, *, n_pad_rows, inv_hw):
    m = pl.program_id(1)

    @pl.when(m == 0)
    def _init():
        acc_ref[...] = jnp.zeros_like(acc_ref)

    x = patches_ref[0]                                                # (tile_m, K_pad)
    y = jnp.dot(x, wc_ref[...], preferred_element_type=jnp.float32)  # MXU, f32 accum
    y = jnp.maximum(y + bc_ref[...], 0.0)                            # bias + ReLU (VPU)

    # Sublane-wise partial sums: (tile_m, C) -> (tile_m//8, 8, C) -> sum over axis 0.
    # Pure vreg-wise VALU adds in the hot loop; the 8->1 cross-sublane (XLU) reduce
    # happens exactly once, in the finalize branch.
    acc_ref[...] += y.reshape(-1, 8, y.shape[-1]).sum(axis=0)

    @pl.when(m == pl.num_programs(1) - 1)
    def _finalize():
        sums = jnp.sum(acc_ref[...], axis=0, keepdims=True)          # (1, C_pad)
        if n_pad_rows:
            # Each padded (all-zero) patch row contributed exactly relu(bias) per
            # channel; remove that constant once instead of masking every step.
            sums = sums - n_pad_rows * jnp.maximum(bc_ref[...], 0.0)
        pooled = sums * inv_hw                                       # global avg pool
        logit = jnp.dot(pooled, wfc_ref[...].astype(jnp.float32),
                        preferred_element_type=jnp.float32) + bfc_ref[...]
        o_ref[0] = jnp.broadcast_to(logit, (8, logit.shape[-1]))     # lane-dense store


def _im2col_nhwc(x, kh, kw):
    """x: (B, H, W, C) -> (B, Ho*Wo, kh*kw*C), VALID, stride 1 (window-major, ch-minor)."""
    B, H, W, C = x.shape
    Ho, Wo = H - kh + 1, W - kw + 1
    pats = jnp.stack(
        [x[:, i:i + Ho, j:j + Wo, :] for i in range(kh) for j in range(kw)],
        axis=3,
    )  # (B, Ho, Wo, kh*kw, C)
    return pats.reshape(B, Ho * Wo, kh * kw * C), Ho, Wo


class SonyDiceNetPallas:
    """Inference forward of SonyDiceNet with a small deterministic stand-in backbone."""

    def __init__(self, key, num_classes=6, in_ch=3, conv_ch=32, ksize=3,
                 mean=(127.5, 127.5, 127.5), std=(127.5, 127.5, 127.5),
                 max_tile_m=4096):
        self.num_classes = num_classes
        self.in_ch = in_ch
        self.conv_ch = conv_ch
        self.ksize = ksize
        # Multiple of 16 (bf16 sublane tile / in-kernel reshape); fits all VMEM budgets.
        self.max_tile_m = max_tile_m

        K = ksize * ksize * in_ch
        self.K = K
        self.K_pad = max(32, _round_up(K, 32))        # 27 -> 32, NOT 128 (4x less HBM)
        self.C_pad = _round_up(conv_ch, LANE)          # keep at 128; do not widen
        self.NC_pad = _round_up(num_classes, LANE)

        k1, k2, k3, k4 = jax.random.split(key, 4)
        conv_w = jax.random.normal(k1, (K, conv_ch), jnp.float32) * 0.05   # HWIO flat
        conv_b = jax.random.normal(k2, (conv_ch,), jnp.float32) * 0.01
        fc_w_torch = jax.random.normal(k3, (num_classes, conv_ch), jnp.float32) * 0.05
        fc_b = jax.random.normal(k4, (num_classes,), jnp.float32) * 0.01

        mean = jnp.asarray(mean, jnp.float32)
        std = jnp.asarray(std, jnp.float32)
        mean_vec = jnp.tile(mean, ksize * ksize)          # matches im2col column order
        invstd_vec = jnp.tile(1.0 / std, ksize * ksize)

        # Fold Norm: ((x-m)*s) @ W + b  ==  x @ (s*W) + (b - (m*s) @ W)
        w_fold = invstd_vec[:, None] * conv_w                           # (K, Cout)
        b_fold = conv_b - (mean_vec * invstd_vec) @ conv_w              # (Cout,)

        # Zero-pad everything; padded rows/cols contribute exactly 0.
        self.conv_w_p = (jnp.zeros((self.K_pad, self.C_pad), jnp.float32)
                         .at[:K, :conv_ch].set(w_fold).astype(jnp.bfloat16))
        self.conv_b_p = (jnp.zeros((1, self.C_pad), jnp.float32)
                         .at[0, :conv_ch].set(b_fold))
        self.fc_w_p = (jnp.zeros((self.C_pad, self.NC_pad), jnp.float32)
                       .at[:conv_ch, :num_classes].set(fc_w_torch.T)
                       .astype(jnp.bfloat16))
        self.fc_b_p = (jnp.zeros((1, self.NC_pad), jnp.float32)
                       .at[0, :num_classes].set(fc_b))

    def forward(self, image_nchw):
        """image_nchw: (B, C, H, W) float32 raw pixels (like torch). Returns dict."""
        B, C, H, W = image_nchw.shape
        assert C == self.in_ch
        k = self.ksize

        # NCHW -> NHWC, bf16 pixels (exact for 0..255 integer-valued pixels).
        x = jnp.transpose(image_nchw, (0, 2, 3, 1)).astype(jnp.bfloat16)
        patches, Ho, Wo = _im2col_nhwc(x, k, k)                         # (B, HW, K) glue
        HW = Ho * Wo

        # Biggest lane/VMEM-friendly M tile: big enough to amortize per-step overhead,
        # small enough (<= ~4 MB double-buffered) to be portable down to v7x's 64 MiB.
        tile_m = min(self.max_tile_m, _round_up(HW, 16))
        n_m = pl.cdiv(HW, tile_m)
        HW_pad = n_m * tile_m
        patches = jnp.pad(
            patches, ((0, 0), (0, HW_pad - HW), (0, self.K_pad - self.K)))

        kernel = functools.partial(
            fused_conv_pool_fc_kernel,
            n_pad_rows=HW_pad - HW, inv_hw=1.0 / HW)

        grid_spec = pltpu.PrefetchScalarGridSpec(
            num_scalar_prefetch=0,
            grid=(B, n_m),
            in_specs=[
                pl.BlockSpec((1, tile_m, self.K_pad), lambda b, m: (b, m, 0)),
                pl.BlockSpec((self.K_pad, self.C_pad), lambda b, m: (0, 0)),
                pl.BlockSpec((1, self.C_pad), lambda b, m: (0, 0)),
                pl.BlockSpec((self.C_pad, self.NC_pad), lambda b, m: (0, 0)),
                pl.BlockSpec((1, self.NC_pad), lambda b, m: (0, 0)),
            ],
            out_specs=pl.BlockSpec((1, 8, self.NC_pad), lambda b, m: (b, 0, 0)),
            scratch_shapes=[pltpu.VMEM((8, self.C_pad), jnp.float32)],
        )

        # Advisory cost estimate with UNPADDED dims.
        flops = 2 * B * HW * self.K * self.conv_ch + 2 * B * self.conv_ch * self.num_classes
        bytes_accessed = (B * HW * self.K * 2                      # patches (bf16)
                          + self.K * self.conv_ch * 2              # conv weight (bf16)
                          + self.conv_ch * 4                       # conv bias
                          + self.conv_ch * self.num_classes * 2    # fc weight (bf16)
                          + self.num_classes * 4                   # fc bias
                          + B * self.num_classes * 4)              # logits

        out = pl.pallas_call(
            kernel,
            out_shape=jax.ShapeDtypeStruct((B, 8, self.NC_pad), jnp.float32),
            grid_spec=grid_spec,
            compiler_params=pltpu.CompilerParams(
                dimension_semantics=("parallel", "arbitrary"),
                vmem_limit_bytes=32 * 1024 * 1024),
            cost_estimate=pl.CostEstimate(
                flops=int(flops), transcendentals=0,
                bytes_accessed=int(bytes_accessed)),
        )(patches, self.conv_w_p, self.conv_b_p, self.fc_w_p, self.fc_b_p)

        # Drop the sublane replica and the lane padding before anything downstream.
        logit = out[:, 0, :self.num_classes]
        return {"logit": logit}

    def predict(self, image_nchw):
        # TODO(synk): h_flip TTA branch of torch predict() is not implemented.
        return jax.nn.softmax(self.forward(image_nchw)["logit"], axis=1)


def _reference_forward(net: SonyDiceNetPallas, image_nchw):
    """Pure-JAX reference of the same stand-in network (same bf16-rounded params)."""
    x = jnp.transpose(image_nchw, (0, 2, 3, 1)).astype(jnp.bfloat16)
    patches, Ho, Wo = _im2col_nhwc(x, net.ksize, net.ksize)
    p = patches.astype(jnp.float32)                                     # (B, HW, K)
    w = net.conv_w_p.astype(jnp.float32)[:net.K, :]                     # (K, C_pad)
    y = jnp.maximum(
        jnp.einsum("bhk,kc->bhc", p, w, precision=lax.Precision.HIGHEST)
        + net.conv_b_p, 0.0)
    pooled = y.mean(axis=1)                                             # (B, C_pad)
    logit = jnp.dot(pooled, net.fc_w_p.astype(jnp.float32),
                    precision=lax.Precision.HIGHEST) + net.fc_b_p
    return logit[:, :net.num_classes]


if __name__ == "__main__":
    key = jax.random.PRNGKey(0)
    k_img, k_params = jax.random.split(key)

    # Small RGB batch of integer-valued raw pixels (like uint8 images).
    B, C, H, W = 2, 3, 16, 16
    image = jnp.round(
        jax.random.uniform(k_img, (B, C, H, W), jnp.float32, 0.0, 255.0))

    net = SonyDiceNetPallas(k_params, num_classes=6, in_ch=C, conv_ch=32, ksize=3)

    out = net.forward(image)
    logit = jax.block_until_ready(out["logit"])
    assert logit.shape == (B, 6), logit.shape

    ref = _reference_forward(net, image)
    assert jnp.allclose(logit, ref, atol=1e-2, rtol=1e-3), (logit, ref)

    probs = jax.block_until_ready(net.predict(image))
    assert probs.shape == (B, 6), probs.shape

    print("KERNEL_OK")
</pallas_src>

<mosaic_0001>
module attributes {stable_mosaic.version = 11 : i64} {
  func.func @fused_conv_pool_fc_kernel(%arg0: i32, %arg1: i32, %arg2: memref<1x208x32xbf16, #tpu.memory_space<vmem>>, %arg3: memref<32x128xbf16, #tpu.memory_space<vmem>>, %arg4: memref<1x128xf32, #tpu.memory_space<vmem>>, %arg5: memref<128x128xbf16, #tpu.memory_space<vmem>>, %arg6: memref<1x128xf32, #tpu.memory_space<vmem>>, %arg7: memref<1x8x128xf32, #tpu.memory_space<vmem>>, %arg8: memref<8x128xf32, #tpu.memory_space<vmem>>) attributes {dimension_semantics = [#tpu.dimension_semantics<parallel>, #tpu.dimension_semantics<arbitrary>], iteration_bounds = array<i64: 2, 1>, scalar_prefetch = 0 : i64, scratch_operands = 1 : i64, tpu.core_type = #tpu.core_type<tc>, window_params = [{transform_indices = @transform_0, window_bounds = array<i64: 1, 208, 32>}, {pipeline_mode = #tpu.pipeline_mode<synchronous>, transform_indices = @transform_1, window_bounds = array<i64: 32, 128>}, {pipeline_mode = #tpu.pipeline_mode<synchronous>, transform_indices = @transform_2, window_bounds = array<i64: 1, 128>}, {pipeline_mode = #tpu.pipeline_mode<synchronous>, transform_indices = @transform_3, window_bounds = array<i64: 128, 128>}, {pipeline_mode = #tpu.pipeline_mode<synchronous>, transform_indices = @transform_4, window_bounds = array<i64: 1, 128>}, {transform_indices = @transform_5, window_bounds = array<i64: 1, 8, 128>}]} {
    %c0_i32 = arith.constant 0 : i32
    %0 = arith.cmpi eq, %arg1, %c0_i32 : i32
    %1 = arith.extui %0 : i1 to i32
    %c0_i32_0 = arith.constant 0 : i32
    %2 = arith.cmpi ne, %1, %c0_i32_0 : i32
    scf.if %2 {
      %cst_15 = arith.constant 0.000000e+00 : f32
      %20 = vector.broadcast %cst_15 : f32 to vector<8x128xf32>
      %c0_16 = arith.constant 0 : index
      %c0_17 = arith.constant 0 : index
      %21 = vector.load %arg8[%c0_16, %c0_17] : memref<8x128xf32, #tpu.memory_space<vmem>>, vector<8x128xf32>
      tpu.vector_store %arg8[%c0_16, %c0_17], %20 {strides = array<i32>} : memref<8x128xf32, #tpu.memory_space<vmem>>, vector<8x128xf32>,
    } else {
    }
    %c0 = arith.constant 0 : index
    %c0_1 = arith.constant 0 : index
    %c0_2 = arith.constant 0 : index
    %3 = vector.load %arg2[%c0, %c0_1, %c0_2] : memref<1x208x32xbf16, #tpu.memory_space<vmem>>, vector<1x208x32xbf16>
    %4 = vector.shape_cast %3 : vector<1x208x32xbf16> to vector<208x32xbf16>
    %c0_3 = arith.constant 0 : index
    %c0_4 = arith.constant 0 : index
    %5 = vector.load %arg3[%c0_3, %c0_4] : memref<32x128xbf16, #tpu.memory_space<vmem>>, vector<32x128xbf16>
    %cst = arith.constant dense<0.000000e+00> : vector<208x128xf32>
    %6 = tpu.matmul %4, %5, %cst {dimension_numbers = #tpu.dot_dimension_numbers<[1], [0], [0], [1], [0, 0, 1, 1], [], []>} : vector<208x32xbf16>, vector<32x128xbf16>, vector<208x128xf32> -> vector<208x128xf32>
    %c0_5 = arith.constant 0 : index
    %c0_6 = arith.constant 0 : index
    %7 = vector.load %arg4[%c0_5, %c0_6] : memref<1x128xf32, #tpu.memory_space<vmem>>, vector<1x128xf32>
    %8 = vector.broadcast %7 : vector<1x128xf32> to vector<208x128xf32>
    %9 = arith.addf %6, %8 : vector<208x128xf32>
    %cst_7 = arith.constant 0.000000e+00 : f32
    %10 = vector.broadcast %cst_7 : f32 to vector<208x128xf32>
    %11 = arith.maximumf %9, %10 : vector<208x128xf32>
    %c0_8 = arith.constant 0 : index
    %c0_9 = arith.constant 0 : index
    %12 = vector.load %arg8[%c0_8, %c0_9] : memref<8x128xf32, #tpu.memory_space<vmem>>, vector<8x128xf32>
    %13 = vector.shape_cast %11 : vector<208x128xf32> to vector<26x8x128xf32>
    %cst_10 = arith.constant dense<0.000000e+00> : vector<8x128xf32>
    %14 = vector.multi_reduction <add>, %13, %cst_10 [0] : vector<26x8x128xf32> to vector<8x128xf32>
    %15 = arith.addf %12, %14 : vector<8x128xf32>
    %c0_11 = arith.constant 0 : index
    %c0_12 = arith.constant 0 : index
    %16 = vector.load %arg8[%c0_11, %c0_12] : memref<8x128xf32, #tpu.memory_space<vmem>>, vector<8x128xf32>
    tpu.vector_store %arg8[%c0_11, %c0_12], %15 {strides = array<i32>} : memref<8x128xf32, #tpu.memory_space<vmem>>, vector<8x128xf32>,
    %c0_i32_13 = arith.constant 0 : i32
    %17 = arith.cmpi eq, %arg1, %c0_i32_13 : i32
    %18 = arith.extui %17 : i1 to i32
    %c0_i32_14 = arith.constant 0 : i32
    %19 = arith.cmpi ne, %18, %c0_i32_14 : i32
    scf.if %19 {
      %c0_15 = arith.constant 0 : index
      %c0_16 = arith.constant 0 : index
      %20 = vector.load %arg8[%c0_15, %c0_16] : memref<8x128xf32, #tpu.memory_space<vmem>>, vector<8x128xf32>
      %cst_17 = arith.constant dense<0.000000e+00> : vector<128xf32>
      %21 = vector.multi_reduction <add>, %20, %cst_17 [0] : vector<8x128xf32> to vector<128xf32>
      %22 = vector.shape_cast %21 : vector<128xf32> to vector<1x128xf32>
      %c0_18 = arith.constant 0 : index
      %c0_19 = arith.constant 0 : index
      %23 = vector.load %arg4[%c0_18, %c0_19] : memref<1x128xf32, #tpu.memory_space<vmem>>, vector<1x128xf32>
      %cst_20 = arith.constant 0.000000e+00 : f32
      %24 = vector.broadcast %cst_20 : f32 to vector<1x128xf32>
      %25 = arith.maximumf %23, %24 : vector<1x128xf32>
      %cst_21 = arith.constant 1.200000e+01 : f32
      %26 = vector.broadcast %cst_21 : f32 to vector<1x128xf32>
      %27 = arith.mulf %26, %25 : vector<1x128xf32>
      %28 = arith.subf %22, %27 : vector<1x128xf32>
      %cst_22 = arith.constant 0.00510204071 : f32
      %29 = vector.broadcast %cst_22 : f32 to vector<1x128xf32>
      %30 = arith.mulf %28, %29 : vector<1x128xf32>
      %c0_23 = arith.constant 0 : index
      %c0_24 = arith.constant 0 : index
      %31 = vector.load %arg5[%c0_23, %c0_24] : memref<128x128xbf16, #tpu.memory_space<vmem>>, vector<128x128xbf16>
      %32 = arith.extf %31 : vector<128x128xbf16> to vector<128x128xf32>
      %cst_25 = arith.constant dense<0.000000e+00> : vector<1x128xf32>
      %33 = tpu.matmul %30, %32, %cst_25 {dimension_numbers = #tpu.dot_dimension_numbers<[1], [0], [0], [1], [0, 0, 1, 1], [], []>} : vector<1x128xf32>, vector<128x128xf32>, vector<1x128xf32> -> vector<1x128xf32>
      %c0_26 = arith.constant 0 : index
      %c0_27 = arith.constant 0 : index
      %34 = vector.load %arg6[%c0_26, %c0_27] : memref<1x128xf32, #tpu.memory_space<vmem>>, vector<1x128xf32>
      %35 = arith.addf %33, %34 : vector<1x128xf32>
      %36 = vector.shape_cast %35 : vector<1x128xf32> to vector<1x128xf32>
      %37 = vector.broadcast %36 : vector<1x128xf32> to vector<8x128xf32>
      %c0_28 = arith.constant 0 : index
      %c0_29 = arith.constant 0 : index
      %c0_30 = arith.constant 0 : index
      %38 = vector.load %arg7[%c0_28, %c0_29, %c0_30] : memref<1x8x128xf32, #tpu.memory_space<vmem>>, vector<1x8x128xf32>
      %39 = vector.shape_cast %38 : vector<1x8x128xf32> to vector<8x128xf32>
      %40 = vector.shape_cast %37 : vector<8x128xf32> to vector<1x8x128xf32>
      tpu.vector_store %arg7[%c0_28, %c0_29, %c0_30], %40 {strides = array<i32>} : memref<1x8x128xf32, #tpu.memory_space<vmem>>, vector<1x8x128xf32>,
    } else {
    }
    return
  }
  func.func @transform_0(%arg0: i32, %arg1: i32) -> (i32, i32, i32) {
    %c0_i32 = arith.constant 0 : i32
    %c0_i32_0 = arith.constant 0 : i32
    return %arg0, %arg1, %c0_i32 : i32, i32, i32
  }
  func.func @transform_1(%arg0: i32, %arg1: i32) -> (i32, i32) {
    %c0_i32 = arith.constant 0 : i32
    %c0_i32_0 = arith.constant 0 : i32
    %c0_i32_1 = arith.constant 0 : i32
    return %c0_i32, %c0_i32_0 : i32, i32
  }
  func.func @transform_2(%arg0: i32, %arg1: i32) -> (i32, i32) {
    %c0_i32 = arith.constant 0 : i32
    %c0_i32_0 = arith.constant 0 : i32
    %c0_i32_1 = arith.constant 0 : i32
    return %c0_i32, %c0_i32_0 : i32, i32
  }
  func.func @transform_3(%arg0: i32, %arg1: i32) -> (i32, i32) {
    %c0_i32 = arith.constant 0 : i32
    %c0_i32_0 = arith.constant 0 : i32
    %c0_i32_1 = arith.constant 0 : i32
    return %c0_i32, %c0_i32_0 : i32, i32
  }
  func.func @transform_4(%arg0: i32, %arg1: i32) -> (i32, i32) {
    %c0_i32 = arith.constant 0 : i32
    %c0_i32_0 = arith.constant 0 : i32
    %c0_i32_1 = arith.constant 0 : i32
    return %c0_i32, %c0_i32_0 : i32, i32
  }
  func.func @transform_5(%arg0: i32, %arg1: i32) -> (i32, i32, i32) {
    %c0_i32 = arith.constant 0 : i32
    %c0_i32_0 = arith.constant 0 : i32
    %c0_i32_1 = arith.constant 0 : i32
    return %arg0, %c0_i32, %c0_i32_0 : i32, i32, i32
  }
}

</mosaic_0001>

<bundles_post_ra>
// kernel: tpu_custom_call.1
= control target key start
LH: loop header
LB: loop body
LE: loop exit
PB: predicated region body
PF: predicated region fallthrough
CT: control target
= control target key end

     0   :  { %10 = vsyncpa [#allocation4], 0  ;;  %s1469_s0 = inlined_call_operand.vmem [shape: bf16[2,208,32], index: 0, kind: input, shape index: {}]   ;;  %s1470_s1 = inlined_call_operand.vmem [shape: bf16[32,128], index: 1, kind: input, shape index: {}]   ;;  %s1471_s2 = inlined_call_operand.vmem [shape: f32[1,128], index: 2, kind: input, shape index: {}]   ;;  %s1472_s3 = inlined_call_operand.vmem [shape: bf16[128,128], index: 3, kind: input, shape index: {}]   ;;  %s1473_s4 = inlined_call_operand.vmem [shape: f32[1,128], index: 4, kind: input, shape index: {}]   ;;  %s1474_s5 = inlined_call_operand.hbm [shape: f32[2,8,128], index: 5, kind: output, shape index: {}]  }
   0x1   :  { %12 = vsyncpa [#allocation4 + $0x1], 0  ;;  %s1230_s18 = smov 0   ;;  %s1232_s19 = smov 0  }
   0x2   :  { %s1234_s20 = smov 0   ;;  %s1236_s21 = smov 0  }
   0x3   :  { %s1238_s22 = smov 0   ;;  %s1240_s23 = smov 0  }
   0x4 LB: > { %s812_s24 = sadd.s32 4294967295, %s1194_s23   ;;  %s813_s25 = sadd.s32 4294967294, %s1194_s23   ;;  %s1194_s23 = sphi %s1240_s23, %s18_s23   ;;  %s1190_s22 = sphi %s1238_s22, %s1481_s22   ;;  %s1186_s21 = sphi %s1236_s21, %s1480_s21   ;;  %s1182_s20 = sphi %s1234_s20, %s1479_s20   ;;  %s1178_s19 = sphi %s1232_s19, %s1478_s19   ;;  %s1174_s18 = sphi %s1230_s18, %s1477_s18  }
   0x5   : > { %s30_s26 = sadd.s32 1, %s1190_s22  ;;  %s149_s27 = sadd.s32 1, %s1182_s20 }
   0x6   : > { %p32_p0 = scmp.ge.s32.totalorder %s30_s26, 2  ;;  %p159_p1 = scmp.ne.s32.totalorder %s1182_s20, %s1178_s19 }
   0x7   : > { %p160_p2 = scmp.eq.s32.totalorder %s812_s24, 1  ;;  %p165_p3 = scmp.ne.s32.totalorder %s1178_s19, %s1174_s18 }
   0x8   : > { %s1483_s26 = smov (%p32_p0, %s30_s26), 0  ;;  %p166_p5 = scmp.eq.s32.totalorder %s813_s25, 1 }
   0x9   : > { %p1270_p4 = por %p160_p2, %p159_p1  ;;  %s146_s29 = ssub.s32 %s1190_s22, %s1483_s26 }
   0xa   : > { %p816_p6 = scmp.ge.s32.totalorder %s1194_s23, 1  ;;  %p147_p7 = scmp.eq.s32.totalorder %s146_s29, 0 }
   0xb   : > { %p1277_p8 = por %p166_p5, %p165_p3  ;;  %p209_p9 = scmp.lt.s32.totalorder %s1194_s23, 3 }
   0xc   : > { %s1283_s6 = scalar_select %p147_p7, %s1182_s20, %s149_s27  }
   0xd   : > { %p210_p10 = pnand %p816_p6, %p209_p9 }
   0xe   : > { %v1101_v0 = vld [vmem:[%s1470_s1] sm:$0xff] (!%p210_p10)   ;;  %v1196_v1 = vmov (!%p210_p10), 0.0   ;;  %v1102_v2 = vld [vmem:[%s1470_s1 + $0x8] sm:$0xff] (!%p210_p10)   ;;  %vm1197_vm0 = vmmov (!%p210_p10), 0   ;;  %p242_p11 = scmp.lt.s32.totalorder (!%p210_p10), %s1186_s21, 1  ;;  %vm371_vm1 = vcmask (!%p210_p10), 261120  }
   0xf   : > { %213 = sbr.rel (%p210_p10) target bundleno = 566 (0x236), region = 40  ;;  %923 = vmatprep.subr.bf16.mxu0 (!%p210_p10), %v1196_v1  ;;  %1038 = vmatprep.subr.bf16.mxu1 (!%p210_p10), %v1196_v1  ;;  %v853_v16 = vld [vmem:[%s1472_s3] sm:$0xff] (!%p210_p10)   ;;  %v1198_v17 = vmov (!%p210_p10), 0.0|0.0   ;;  %v884_v18 = vld [vmem:[%s1472_s3 + $0x8] sm:$0xff] (!%p210_p10)   ;;  %v885_v19 = vld [vmem:[%s1472_s3 + $0x10] sm:$0xff] (!%p210_p10)   ;;  %s238_s29 = sand.u32 (!%p210_p10), 1, %s1178_s19  }
  0x10   : > { %924 = vmatpush3.bf16.msra.mxu0 (!%p210_p10), %v1101_v0  ;;  %927 = vmatprep.mubr.msk.bf16.mxu0 (!%p210_p10), %vm1197_vm0, %v1196_v1  ;;  %v886_v20 = vld [vmem:[%s1472_s3 + $0x18] sm:$0xff] (!%p210_p10)   ;;  %v887_v21 = vld [vmem:[%s1472_s3 + $0x20] sm:$0xff] (!%p210_p10)   ;;  %v888_v22 = vld [vmem:[%s1472_s3 + $0x28] sm:$0xff] (!%p210_p10)   ;;  %s817_s7 = sshll.u32 (!%p210_p10), %s238_s29, 3  ;;  %s849_s10 = sshll.u32 (!%p210_p10), %s1186_s21, 7 }
  0x11   : > { %925 = vmatprep.subr.bf16.mxu0 (!%p210_p10), %v1196_v1  ;;  %1040 = vmatpush3.bf16.msra.mxu1 (!%p210_p10), %v1101_v0  ;;  %v889_v23 = vld [vmem:[%s1472_s3 + $0x30] sm:$0xff] (!%p210_p10)   ;;  %v890_v24 = vld [vmem:[%s1472_s3 + $0x38] sm:$0xff] (!%p210_p10)   ;;  %v1365_v25 = vld [vmem:[%s1471_s2] ss:$0 sm:$0xff] (!%p210_p10)  ;;  %s726_s16 = scalar_lea.sflag (!%p210_p10), [#allocation4], %s238_s29 }
  0x12   : > { %1039 = vmatprep.subr.bf16.mxu1 (!%p210_p10), %v1196_v1  ;;  %955 = vmatprep.mubr.msk.bf16.mxu1 (!%p210_p10), %vm1197_vm0, %v1196_v1 }
  0x14   : > { %926 = vmatpush3.bf16.msra.mxu0 (!%p210_p10), %v1102_v2 }
  0x15   : > { %1041 = vmatpush3.bf16.msra.mxu1 (!%p210_p10), %v1102_v2 }
  0x16   : > { %s243_s11 = scalar_select %p242_p11, %s1186_s21, 1  ;;  %1014 = vmatprep.subr.bf16.mxu1 %v1198_v17 }
  0x17   : > { %s1199_s21 = smov [#allocation3]  }
  0x18   : > { %s1042_s12 = smul.u32 104, %s243_s11  ;;  %s240_s11 = scalar_lea.vmem [#allocation3], %s817_s7 }
  0x19   : > { %s1120_s24 = sshll.u32 %s1199_s21, 4  ;;  %s1121_s24 = int_to_ptr.vmem [resolvable:$false] %s1120_s24 }
  0x1a   : > { %s1298_s15 = scalar_lea.vmem %s1469_s0, %s1042_s12  ;;  %s739_s12 = sshll.u32 %s240_s11, 4  ;;  %s1424_s12 = int_to_ptr.vmem [resolvable:$true] %s739_s12 }
  0x1b   : > { %v1103_v3 = vld [vmem:[%s1298_s15] sm:$0xff]   ;;  %v1107_v4 = vld [vmem:[%s1298_s15 + $0x38] sm:$0xff]   ;;  %v1104_v5 = vld [vmem:[%s1298_s15 + $0x8] sm:$0xff]   ;;  %s1116_s17 = scalar_lea.vmem %s1424_s12, 128  ;;  %s1122_s25 = scalar_lea.vmem %s1121_s24, 256 }
  0x1c   : > { %928 = vmatmul.mubr.msk.bf16.vlgmr.msra.gmra.mrb[0].mxu0 %vm371_vm1, %v1103_v3  ;;  %956 = vmatmul.mubr.msk.bf16.vlgmr.msra.gmra.mrb[0].mxu1 %vm371_vm1, %v1107_v4  ;;  %v1109_v6 = vld [vmem:[%s1298_s15 + $0x40] sm:$0xff]   ;;  %v1105_v7 = vld [vmem:[%s1298_s15 + $0x10] sm:$0xff]   ;;  %v1111_v8 = vld [vmem:[%s1298_s15 + $0x48] sm:$0xff]   ;;  %p1117_p12 = scmp.ne.s32.totalorder %s1424_s12, %s1116_s17  ;;  %p1123_p1 = scmp.lt.s32.totalorder %s1424_s12, %s1121_s24 }
  0x1d   : > { %931 = vmatprep.mubr.msk.bf16.mxu0 %vm1197_vm0, %v1196_v1  ;;  %959 = vmatprep.mubr.msk.bf16.mxu1 %vm1197_vm0, %v1196_v1  ;;  %v1106_v9 = vld [vmem:[%s1298_s15 + $0x18] sm:$0xff]   ;;  %v1113_v10 = vld [vmem:[%s1298_s15 + $0x50] sm:$0xff]   ;;  %v1108_v11 = vld [vmem:[%s1298_s15 + $0x20] sm:$0xff]   ;;  %p1124_p2 = scmp.lt.s32.totalorder %s1122_s25, %s1116_s17 }
  0x1e   : > { %v1114_v12 = vld [vmem:[%s1298_s15 + $0x58] sm:$0xff]   ;;  %v1110_v13 = vld [vmem:[%s1298_s15 + $0x28] sm:$0xff]   ;;  %v1115_v14 = vld [vmem:[%s1298_s15 + $0x60] sm:$0xff]   ;;  %1016 = vmatpush3.bf16.msra.mxu1 %v853_v16  ;;  %p1118_p13 = pnand %p1117_p12, %p1270_p4 }
  0x1f   : > { %v1112_v15 = vld [vmem:[%s1298_s15 + $0x30] sm:$0xff]   ;;  %1017 = vmatprep.subr.bf16.mxu1 %v1198_v17  ;;  %s1422_s15 = scalar_lea.hbm %s1474_s5, %s849_s10  ;;  %p1125_p3 = por %p1124_p2, %p1123_p1 }
  0x20   : > { %p1119_p0 = pneg %p1118_p13 }
  0x22   : > { %1019 = vmatpush3.bf16.msra.mxu1 %v884_v18  ;;  %p1126_p5 = pnand %p1125_p3, %p1119_p0 }
  0x23   : > { %1020 = vmatprep.subr.bf16.mxu1 %v1198_v17 }
  0x24   : > { %932 = vmatmul.mubr.msk.bf16.gmra.mrb[4].mxu0 %vm371_vm1, %v1104_v5  ;;  %960 = vmatmul.mubr.msk.bf16.gmra.mrb[4].mxu1 %vm371_vm1, %v1109_v6 }
  0x25   : > { %935 = vmatprep.mubr.msk.bf16.mxu0 %vm1197_vm0, %v1196_v1  ;;  %963 = vmatprep.mubr.msk.bf16.mxu1 %vm1197_vm0, %v1196_v1 }
  0x26   : > { %1022 = vmatpush3.bf16.msra.mxu1 %v885_v19 }
  0x27   : > { %1023 = vmatprep.subr.bf16.mxu1 %v1198_v17 }
  0x2a   : > { %1025 = vmatpush3.bf16.msra.mxu1 %v886_v20 }
  0x2b   : > { %1026 = vmatprep.subr.bf16.mxu1 %v1198_v17 }
  0x2c   : > { %936 = vmatmul.mubr.msk.bf16.gmra.mrb[8].mxu0 %vm371_vm1, %v1105_v7  ;;  %964 = vmatmul.mubr.msk.bf16.gmra.mrb[8].mxu1 %vm371_vm1, %v1111_v8 }
  0x2d   : > { %939 = vmatprep.mubr.msk.bf16.mxu0 %vm1197_vm0, %v1196_v1  ;;  %967 = vmatprep.mubr.msk.bf16.mxu1 %vm1197_vm0, %v1196_v1 }
  0x2e   : > { %1028 = vmatpush3.bf16.msra.mxu1 %v887_v21 }
  0x2f   : > { %1029 = vmatprep.subr.bf16.mxu1 %v1198_v17 }
  0x32   : > { %1031 = vmatpush3.bf16.msra.mxu1 %v888_v22 }
  0x33   : > { %1032 = vmatprep.subr.bf16.mxu1 %v1198_v17 }
  0x34   : > { %940 = vmatmul.mubr.msk.bf16.gmra.mrb[12].mxu0 %vm371_vm1, %v1106_v9  ;;  %968 = vmatmul.mubr.msk.bf16.gmra.mrb[12].mxu1 %vm371_vm1, %v1113_v10 }
  0x35   : > { %943 = vmatprep.mubr.msk.bf16.mxu0 %vm1197_vm0, %v1196_v1  ;;  %971 = vmatprep.mubr.msk.bf16.mxu1 %vm1197_vm0, %v1196_v1 }
  0x36   : > { %1034 = vmatpush3.bf16.msra.mxu1 %v889_v23 }
  0x37   : > { %1035 = vmatprep.subr.bf16.mxu1 %v1198_v17 }
  0x3a   : > { %1037 = vmatpush3.bf16.msra.mxu1 %v890_v24 }
  0x3c   : > { %944 = vmatmul.mubr.msk.bf16.gmra.mrb[16].mxu0 %vm371_vm1, %v1108_v11  ;;  %972 = vmatmul.mubr.msk.bf16.gmra.mrb[16].mxu1 %vm371_vm1, %v1114_v12 }
  0x3d   : > { %947 = vmatprep.mubr.msk.bf16.mxu0 %vm1197_vm0, %v1196_v1  ;;  %975 = vmatprep.mubr.msk.bf16.mxu1 %vm1197_vm0, %v1196_v1 }
  0x44   : > { %948 = vmatmul.mubr.msk.bf16.gmra.mrb[20].mxu0 %vm371_vm1, %v1110_v13  ;;  %976 = vmatmul.mubr.msk.bf16.gmra.mrb[20].mxu1 %vm371_vm1, %v1115_v14 }
  0x45   : > { %951 = vmatprep.mubr.msk.bf16.mxu0 %vm1197_vm0, %v1196_v1  ;;  %1011 = vmatprep.mubr.msk.f32.mxu1 %vm1197_vm0, %v1196_v1 }
  0x4c   : > { %952 = vmatmul.mubr.msk.bf16.gmra.mrb[24].mxu0 %vm371_vm1, %v1112_v15 }
  0xef   : > { %v445_v26 = vpop.f32.mrb[0].mxu0  ;;  %v1369_v32 = vpop.f32.mrb[0].mxu1 }
  0xf0   : > { %v446_v27 = vadd.f32 %v1365_v25, %v445_v26  ;;  %v929_v28 = vpop.f32.mrb[1].mxu0  ;;  %v957_v35 = vpop.f32.mrb[1].mxu1 }
  0xf1   : > { %v448_v29 = vpop.f32.mrb[2].mxu0  ;;  %v1371_v36 = vpop.f32.mrb[2].mxu1 }
  0xf2   : > { %v449_v30 = vadd.f32 %v1365_v25, %v448_v29  ;;  %v930_v31 = vpop.f32.mrb[3].mxu0  ;;  %v548_v33 = vmax.f32 %v446_v27, 0.0  ;;  %v958_v38 = vpop.f32.mrb[3].mxu1 }
  0xf4   : > { %v549_v34 = vmax.f32 %v449_v30, 0.0 }
  0xf6   : > { %v575_v37 = vadd.f32 %v549_v34, %v548_v33 }
  0xf7   : > { %v453_v39 = vpop.f32.mrb[4].mxu0  ;;  %v1375_v46 = vpop.f32.mrb[4].mxu1 }
  0xf8   : > { %v454_v40 = vadd.f32 %v1365_v25, %v453_v39  ;;  %v933_v41 = vpop.f32.mrb[5].mxu0  ;;  %v961_v49 = vpop.f32.mrb[5].mxu1 }
  0xf9   : > { %v456_v42 = vpop.f32.mrb[6].mxu0  ;;  %v1377_v50 = vpop.f32.mrb[6].mxu1 }
  0xfa   : > { %v550_v43 = vmax.f32 %v454_v40, 0.0  ;;  %v457_v44 = vadd.f32 %v1365_v25, %v456_v42  ;;  %v934_v45 = vpop.f32.mrb[7].mxu0  ;;  %v962_v52 = vpop.f32.mrb[7].mxu1 }
  0xfc   : > { %v576_v47 = vadd.f32 %v575_v37, %v550_v43  ;;  %v551_v48 = vmax.f32 %v457_v44, 0.0 }
  0xfe   : > { %v577_v51 = vadd.f32 %v576_v47, %v551_v48 }
  0xff   : > { %v461_v53 = vpop.f32.mrb[8].mxu0  ;;  %v1381_v60 = vpop.f32.mrb[8].mxu1 }
 0x100   : > { %v462_v54 = vadd.f32 %v1365_v25, %v461_v53  ;;  %v937_v55 = vpop.f32.mrb[9].mxu0  ;;  %v965_v63 = vpop.f32.mrb[9].mxu1 }
 0x101   : > { %v464_v56 = vpop.f32.mrb[10].mxu0  ;;  %v1383_v0 = vpop.f32.mrb[10].mxu1  ;;  %v510_v63 = vadd.f32 %v1365_v25, %v1375_v46 }
 0x102   : > { %v552_v57 = vmax.f32 %v462_v54, 0.0  ;;  %v465_v58 = vadd.f32 %v1365_v25, %v464_v56  ;;  %v938_v59 = vpop.f32.mrb[11].mxu0  ;;  %v966_v2 = vpop.f32.mrb[11].mxu1  ;;  %v502_v54 = vadd.f32 %v1365_v25, %v1369_v32 }
 0x103   : > { %v564_v32 = vmax.f32 %v510_v63, 0.0 }
 0x104   : > { %v578_v61 = vadd.f32 %v577_v51, %v552_v57  ;;  %v553_v62 = vmax.f32 %v465_v58, 0.0  ;;  %v505_v58 = vadd.f32 %v1365_v25, %v1371_v36  ;;  %v521_v36 = vadd.f32 %v1365_v25, %v1383_v0 }
 0x106   : > { %v579_v1 = vadd.f32 %v578_v61, %v553_v62  ;;  %v562_v62 = vmax.f32 %v502_v54, 0.0  ;;  %v563_v2 = vmax.f32 %v505_v58, 0.0 }
 0x107   : > { %v469_v3 = vpop.f32.mrb[12].mxu0  ;;  %v525_v10 = vpop.f32.mrb[12].mxu1 }
 0x108   : > { %v470_v4 = vadd.f32 %v1365_v25, %v469_v3  ;;  %v941_v5 = vpop.f32.mrb[13].mxu0  ;;  %v969_v13 = vpop.f32.mrb[13].mxu1  ;;  %v513_v3 = vadd.f32 %v1365_v25, %v1377_v50 }
 0x109   : > { %v472_v6 = vpop.f32.mrb[14].mxu0  ;;  %v528_v14 = vpop.f32.mrb[14].mxu1  ;;  %v518_v5 = vadd.f32 %v1365_v25, %v1381_v60 }
 0x10a   : > { %v554_v7 = vmax.f32 %v470_v4, 0.0  ;;  %v473_v8 = vadd.f32 %v1365_v25, %v472_v6  ;;  %v942_v9 = vpop.f32.mrb[15].mxu0  ;;  %v970_v16 = vpop.f32.mrb[15].mxu1 }
 0x10b   : > { %v566_v9 = vmax.f32 %v518_v5, 0.0 }
 0x10c   : > { %v580_v11 = vadd.f32 %v579_v1, %v554_v7  ;;  %v555_v12 = vmax.f32 %v473_v8, 0.0  ;;  %v565_v7 = vmax.f32 %v513_v3, 0.0 }
 0x10e   : > { %v581_v15 = vadd.f32 %v580_v11, %v555_v12  ;;  %v526_v11 = vadd.f32 %v1365_v25, %v525_v10  ;;  %v567_v12 = vmax.f32 %v521_v36, 0.0 }
 0x10f   : > { %v477_v17 = vpop.f32.mrb[16].mxu0  ;;  %v533_v24 = vpop.f32.mrb[16].mxu1 }
 0x110   : > { %v478_v18 = vadd.f32 %v1365_v25, %v477_v17  ;;  %v945_v19 = vpop.f32.mrb[17].mxu0  ;;  %v973_v28 = vpop.f32.mrb[17].mxu1  ;;  %v568_v50 = vmax.f32 %v526_v11, 0.0  ;;  %v534_v17 = vadd.f32 %v1365_v25, %v533_v24  ;;  %v612_v24 = vld [vmem:[%s1471_s2] sm:$0x1] }
 0x111   : > { %v480_v20 = vpop.f32.mrb[18].mxu0  ;;  %v536_v29 = vpop.f32.mrb[18].mxu1 }
 0x112   : > { %v556_v21 = vmax.f32 %v478_v18, 0.0  ;;  %v481_v22 = vadd.f32 %v1365_v25, %v480_v20  ;;  %v946_v23 = vpop.f32.mrb[19].mxu0  ;;  %v974_v31 = vpop.f32.mrb[19].mxu1  ;;  %v537_v19 = vadd.f32 %v1365_v25, %v536_v29 }
 0x114   : > { %v582_v26 = vadd.f32 %v581_v15, %v556_v21  ;;  %v557_v27 = vmax.f32 %v481_v22, 0.0  ;;  %v529_v15 = vadd.f32 %v1365_v25, %v528_v14  ;;  %v570_v21 = vmax.f32 %v534_v17, 0.0 }
 0x115   : > { %v571_v23 = vmax.f32 %v537_v19, 0.0 }
 0x116   : > { %v583_v30 = vadd.f32 %v582_v26, %v557_v27  ;;  %v569_v60 = vmax.f32 %v529_v15, 0.0 }
 0x117   : > { %v485_v33 = vpop.f32.mrb[20].mxu0  ;;  %v541_v41 = vpop.f32.mrb[20].mxu1 }
 0x118   : > { %v486_v34 = vadd.f32 %v1365_v25, %v485_v33  ;;  %v949_v35 = vpop.f32.mrb[21].mxu0  ;;  %v977_v44 = vpop.f32.mrb[21].mxu1  ;;  %v542_v20 = vadd.f32 %v1365_v25, %v541_v41  ;;  %v720_v41 = vlaneseq }
 0x119   : > { %v488_v37 = vpop.f32.mrb[22].mxu0  ;;  %v544_v45 = vpop.f32.mrb[22].mxu1 }
 0x11a   : > { %v558_v38 = vmax.f32 %v486_v34, 0.0  ;;  %v489_v39 = vadd.f32 %v1365_v25, %v488_v37  ;;  %v950_v40 = vpop.f32.mrb[23].mxu0  ;;  %v978_v48 = vpop.f32.mrb[23].mxu1  ;;  %v572_v10 = vmax.f32 %v542_v20, 0.0  ;;  %v545_v26 = vadd.f32 %v1365_v25, %v544_v45 }
 0x11b   : > { %v613_v34 = vmax.f32 %v612_v24, 0.0 }
 0x11c   : > { %v584_v42 = vadd.f32 %v583_v30, %v558_v38  ;;  %v559_v43 = vmax.f32 %v489_v39, 0.0  ;;  %v573_v14 = vmax.f32 %v545_v26, 0.0 }
 0x11d   : > { %v614_v38 = vmul.f32 12.0, %v613_v34 }
 0x11e   : > { %v585_v47 = vadd.f32 %v584_v42, %v559_v43  ;;  %v721_v42 = vshrl.u32 %v720_v41, 7  ;;  %v649_v43 = vld [vmem:[%s1473_s4] sm:$0x1] }
 0x11f   : > { %v493_v49 = vpop.f32.mrb[24].mxu0 }
 0x120   : > { %v494_v51 = vadd.f32 %v1365_v25, %v493_v49  ;;  %v953_v52 = vpop.f32.mrb[25].mxu0  ;;  %v722_v44 = vsub.s32 0, %v721_v42 }
 0x121   : > { %v496_v53 = vpop.f32.mrb[26].mxu0 }
 0x122   : > { %v560_v55 = vmax.f32 %v494_v51, 0.0  ;;  %v497_v56 = vadd.f32 %v1365_v25, %v496_v53  ;;  %v954_v57 = vpop.f32.mrb[27].mxu0 }
 0x124   : > { %v586_v59 = vadd.f32 %v585_v47, %v560_v55  ;;  %v561_v61 = vmax.f32 %v497_v56, 0.0 }
 0x126   : > { %v587_v1 = vadd.f32 %v586_v59, %v561_v61 }
 0x128   : > { %v588_v4 = vadd.f32 %v587_v1, %v562_v62 }
 0x12a   : > { %v589_v6 = vadd.f32 %v588_v4, %v563_v2 }
 0x12c   : > { %v590_v8 = vadd.f32 %v589_v6, %v564_v32 }
 0x12e   : > { %v591_v46 = vadd.f32 %v590_v8, %v565_v7 }
 0x130   : > { %v592_v13 = vadd.f32 %v591_v46, %v566_v9 }
 0x132   : > { %v593_v16 = vadd.f32 %v592_v13, %v567_v12 }
 0x134   : > { %v594_v18 = vadd.f32 %v593_v16, %v568_v50 }
 0x136   : > { %v595_v0 = vadd.f32 %v594_v18, %v569_v60 }
 0x138   : > { %v596_v22 = vadd.f32 %v595_v0, %v570_v21 }
 0x13a   : > { %v597_v27 = vadd.f32 %v596_v22, %v571_v23 }
 0x13c   : > { %v598_v28 = vadd.f32 %v597_v27, %v572_v10 }
 0x13e   : > { %v599_v30 = vadd.f32 %v598_v28, %v573_v14 }
 0x140   : > { %v606_v31 = vrot.slane %v599_v30, 4 }
 0x142   : > { %v607_v29 = vadd.f32 %v606_v31, %v599_v30 }
 0x144   : > { %v608_v33 = vrot.slane %v607_v29, 2 }
 0x146   : > { %v609_v35 = vadd.f32 %v608_v33, %v607_v29 }
 0x148   : > { %v610_v37 = vrot.slane %v609_v35, 1 }
 0x14a   : > { %v611_v39 = vadd.f32 %v610_v37, %v609_v35 }
 0x14c   : > { %v615_v40 = vsub.f32 %v611_v39, %v614_v38 }
 0x14e   : > { %v616_v25 = vmul.f32 0.0051020407, %v615_v40 }
 0x150   : > { %1012 = vmatmul.mubr.f32.vlgmr.msra.gmra.mrb[24].mxu1 %v616_v25 }
 0x223   : > { %v716_v45 = vpop.f32.mrb[24].mxu1 }
 0x224   : > { %v717_v47 = vadd.f32 %v716_v45, %v649_v43  ;;  %v1013_v48 = vpop.f32.mrb[25].mxu1 }
 0x226   : > { %v723_v49 = vrot.slane %v717_v47, %v722_v44 }
 0x228   : > { %724 = vst [vmem:[%s240_s11] sm:$0xff] %v723_v49 }
 0x229   : > { %1129 = shalt.err (!%p1126_p5)
}
 0x22a   : > { %s1130_s27 = scalar_lea.hbm %s1422_s15, 128  ;;  %s1134_s8 = scalar_lea.hbm %s1474_s5, 256 }
 0x22b   : > { %p1131_p6 = scmp.ne.s32.totalorder %s1422_s15, %s1130_s27  ;;  %p1135_p10 = scmp.lt.u32.totalorder %s1422_s15, %s1474_s5 }
 0x22c   : > { %p1136_p11 = scmp.lt.u32.totalorder %s1134_s8, %s1130_s27  ;;  %p1138_p13 = scmp.lt.u32.totalorder %s1130_s27, %s1422_s15 }
 0x22d   : > { %p1132_p7 = pnand %p1131_p6, %p1270_p4 }
 0x22e   : > { %p1137_p12 = por %p1136_p11, %p1135_p10 }
 0x22f   : > { %p1133_p9 = pneg %p1132_p7 }
 0x230   : > { %p1139_p0 = por %p1138_p13, %p1137_p12 }
 0x232   : > { %p1140_p1 = pnand %p1139_p0, %p1133_p9 }
 0x234   : > { %1143 = shalt.err (!%p1140_p1)
}
 0x235   : > { %1043 = dma.vmem_to_hbm [thread:$0]  (%p1270_p4), %s1424_s12, 128, %s1422_s15, %s726_s16  }
 0x236 PF: > { %p1049_p2 = scmp.ge.s32.totalorder %s1194_s23, 2  ;;  %s751_s11 = sand.u32 1, %s1174_s18  }
 0x237   : > { %s752_s13 = scalar_lea.sflag [#allocation4], %s751_s11 }
 0x238   : > { %p1046_p3 = pnand %p1049_p2, %p1277_p8 }
 0x23a   : > { %1169 = dma.done.wait (!%p1046_p3), %s752_s13, 128  }
 0x23b   : > { %1171 = vsyncadd (!%p1046_p3), %s752_s13, 4294967168  ;;  %s18_s23 = sadd.s32 1, %s1194_s23   ;;  %s1477_s18 = smov %s1178_s19 }
 0x23c   : > { %p15_p5 = scmp.ge.s32.totalorder %s18_s23, 4   ;;  %s1478_s19 = smov %s1182_s20 }
 0x23d   : > { %s1479_s20 = smov %s1283_s6  ;;  %s1480_s21 = smov %s1190_s22 }
 0x23e   : > { %s1481_s22 = smov %s1483_s26  ;;  %17 = sbr.rel (!%p15_p5) target bundleno = 4 (0x4), region = 83 }
 0x245   :  { %757 = vsyncpa [#allocation4], 1 }
 0x246   :  { %759 = vsyncpa [#allocation4 + $0x1], 1 }

</bundles_post_ra>
